<compile_context>
chip_gen: v7x
topology: tpu7x:2x2x1
jax: 0.10.0
libtpu: 0.0.40
codegen_flags: <defaults>
</compile_context>

<pallas_src>
import functools
import math

import jax
import jax.numpy as jnp
from jax.experimental import pallas as pl
from jax.experimental.pallas import tpu as pltpu


def _round_up(x, m):
    return (x + m - 1) // m * m


def _pe_kernel(pos_ref, const_ref, out_ref):
    # pos_ref:   (TM, 1)   f32  flattened positions (one row tile)
    # const_ref: (2, C)    f32  row 0 = 1/denom (repeat-tiled), row 1 = phase
    # out_ref:   (TM, C)   out_dtype
    inv_denom = const_ref[0:1, :]                    # (1, C)
    phase = const_ref[1:2, :]                        # (1, C)
    arg = pos_ref[...] * inv_denom + phase           # VPU: 1 mul + 1 add / elem
    # jnp.sin = range reduction + VALU polynomial (the real per-element cost
    # on v6e/v7x); one transcendental evaluation per element.
    out_ref[...] = jnp.sin(arg).astype(out_ref.dtype)


def _choose_block_rows(n_rows, n_chan, out_itemsize,
                       target_out_bytes=2 << 20, vmem_budget=8 << 20):
    """Rows per grid step: ~2 MiB output/step, VMEM-bounded, >= 2 grid steps."""
    lane = 128
    # VMEM footprint per row of a tile (lane-padded, double-buffered by Pallas)
    out_row = _round_up(n_chan, lane) * out_itemsize     # output tile row
    pos_row = lane * 4                                   # (TM,1) f32 -> (TM,128)
    tm = max(8, target_out_bytes // max(1, n_chan * out_itemsize))
    tm = min(tm, max(8, vmem_budget // (2 * (out_row + pos_row))))
    if n_rows > 8:
        # keep >= 2 grid steps so the v7x megacore can split the parallel axis
        tm = min(tm, _round_up((n_rows + 1) // 2, 8))
    tm = min(tm, _round_up(n_rows, 8))                   # never exceed row count
    return _round_up(max(tm, 8), 8)


@functools.partial(
    jax.jit,
    static_argnames=("d", "T", "repeat", "offset", "block_rows", "out_dtype"),
)
def positional_encoder(batch_positions, *, d, T=1000, repeat=None, offset=0,
                       block_rows=None, out_dtype=jnp.float32):
    """JAX/Pallas equivalent of PositionalEncoder(d, T, repeat, offset).forward."""
    B, S = batch_positions.shape
    rep = 1 if repeat is None else int(repeat)
    d_out = d * rep

    # --- constants (same float formula as the torch __init__ / forward) ---
    i = jnp.arange(offset, offset + d, dtype=jnp.float32)
    denom = jnp.power(jnp.float32(T), 2.0 * jnp.floor(i / 2.0) / jnp.float32(d))
    inv_denom = (1.0 / denom).astype(jnp.float32)
    # sin/cos parity uses the *local* channel index (matches torch's 0::2/1::2
    # slicing); `offset` only enters the denominator.
    phase = jnp.where(jnp.arange(d) % 2 == 0,
                      jnp.float32(0.0), jnp.float32(math.pi / 2.0))
    if rep > 1:  # fuse torch.cat([table] * repeat, dim=-1) into the constants
        inv_denom = jnp.tile(inv_denom, rep)
        phase = jnp.tile(phase, rep)
    consts = jnp.stack([inv_denom, phase], axis=0)       # (2, d_out)

    # --- row tiling (no padding: ragged last block is masked by Pallas) ---
    N = B * S
    pos_flat = batch_positions.reshape(N, 1).astype(jnp.float32)

    out_itemsize = jnp.dtype(out_dtype).itemsize
    TM = (int(block_rows) if block_rows is not None
          else _choose_block_rows(N, d_out, out_itemsize))
    TM = _round_up(max(8, TM), 8)
    grid = (pl.cdiv(N, TM),)

    cost = pl.CostEstimate(
        flops=2 * N * d_out,                       # mul + add per element
        transcendentals=N * d_out,                 # one sin per element
        bytes_accessed=4 * N + 8 * d_out + N * d_out * out_itemsize,
    )

    out = pl.pallas_call(
        _pe_kernel,
        out_shape=jax.ShapeDtypeStruct((N, d_out), out_dtype),
        grid=grid,
        in_specs=[
            pl.BlockSpec((TM, 1), lambda i: (i, 0)),
            pl.BlockSpec((2, d_out), lambda i: (0, 0)),
        ],
        out_specs=pl.BlockSpec((TM, d_out), lambda i: (i, 0)),
        compiler_params=pltpu.CompilerParams(
            dimension_semantics=("parallel",),
        ),
        cost_estimate=cost,
    )(pos_flat, consts)

    # contiguous reshape (free); `repeat` already fused, no slicing needed
    return out.reshape(B, S, d_out)


def _reference(batch_positions, *, d, T=1000, repeat=None, offset=0):
    """Pure-JAX reference mirroring the PyTorch forward (sin/cos + slicing)."""
    i = jnp.arange(offset, offset + d, dtype=jnp.float32)
    denom = jnp.power(jnp.float32(T), 2.0 * jnp.floor(i / 2.0) / jnp.float32(d))
    table = batch_positions[:, :, None].astype(jnp.float32) / denom[None, None, :]
    ch = jnp.arange(d)
    table = jnp.where(ch[None, None, :] % 2 == 0, jnp.sin(table), jnp.cos(table))
    if repeat is not None:
        table = jnp.concatenate([table for _ in range(repeat)], axis=-1)
    return table


if __name__ == "__main__":
    key = jax.random.PRNGKey(0)
    B, S, d = 2, 8, 32
    # positions: small integer-like timestamps (e.g. day-of-year), as floats
    batch_positions = jax.random.randint(key, (B, S), 0, 365).astype(jnp.float32)

    # base path (d_out=32 < 128: narrow-channel blocks, no padding/slicing)
    out = jax.block_until_ready(positional_encoder(batch_positions, d=d))
    ref = _reference(batch_positions, d=d)
    assert out.shape == (B, S, d), out.shape
    assert jnp.allclose(out, ref, atol=1e-4, rtol=1e-5), "mismatch vs reference"

    # fused-`repeat` path
    out_rep = jax.block_until_ready(
        positional_encoder(batch_positions, d=d, repeat=2))
    ref_rep = _reference(batch_positions, d=d, repeat=2)
    assert out_rep.shape == (B, S, 2 * d), out_rep.shape
    assert jnp.allclose(out_rep, ref_rep, atol=1e-4, rtol=1e-5)

    # ragged row count (N % TM != 0) exercises the masked last block + offset
    pos_odd = jax.random.randint(jax.random.PRNGKey(1), (2, 13), 0, 365)
    pos_odd = pos_odd.astype(jnp.float32)
    out_odd = jax.block_until_ready(positional_encoder(pos_odd, d=d, offset=1))
    ref_odd = _reference(pos_odd, d=d, offset=1)
    assert out_odd.shape == (2, 13, d), out_odd.shape
    assert jnp.allclose(out_odd, ref_odd, atol=1e-4, rtol=1e-5)

    # bf16 store path (halves HBM write traffic; arithmetic stays f32)
    out_bf16 = jax.block_until_ready(
        positional_encoder(batch_positions, d=d, out_dtype=jnp.bfloat16))
    assert out_bf16.dtype == jnp.bfloat16
    assert jnp.allclose(out_bf16.astype(jnp.float32), ref, atol=2e-2)

    print("KERNEL_OK")
</pallas_src>

<mosaic_0001>
module attributes {stable_mosaic.version = 11 : i64} {
  func.func @_pe_kernel(%arg0: i32, %arg1: memref<8x1xf32, #tpu.memory_space<vmem>>, %arg2: memref<2x32xf32, #tpu.memory_space<vmem>>, %arg3: memref<8x32xf32, #tpu.memory_space<vmem>>) attributes {dimension_semantics = [#tpu.dimension_semantics<parallel>], iteration_bounds = array<i64: 2>, scalar_prefetch = 0 : i64, scratch_operands = 0 : i64, tpu.core_type = #tpu.core_type<tc>, window_params = [{transform_indices = @transform_0, window_bounds = array<i64: 8, 1>}, {pipeline_mode = #tpu.pipeline_mode<synchronous>, transform_indices = @transform_1, window_bounds = array<i64: 2, 32>}, {transform_indices = @transform_2, window_bounds = array<i64: 8, 32>}]} {
    %c0 = arith.constant 0 : index
    %c0_0 = arith.constant 0 : index
    %0 = vector.load %arg2[%c0, %c0_0] : memref<2x32xf32, #tpu.memory_space<vmem>>, vector<1x32xf32>
    %c1 = arith.constant 1 : index
    %c0_1 = arith.constant 0 : index
    %1 = vector.load %arg2[%c1, %c0_1] : memref<2x32xf32, #tpu.memory_space<vmem>>, vector<1x32xf32>
    %c0_2 = arith.constant 0 : index
    %c0_3 = arith.constant 0 : index
    %2 = vector.load %arg1[%c0_2, %c0_3] : memref<8x1xf32, #tpu.memory_space<vmem>>, vector<8x1xf32>
    %3 = vector.broadcast %2 : vector<8x1xf32> to vector<8x32xf32>
    %4 = vector.broadcast %0 : vector<1x32xf32> to vector<8x32xf32>
    %5 = arith.mulf %3, %4 : vector<8x32xf32>
    %6 = vector.broadcast %1 : vector<1x32xf32> to vector<8x32xf32>
    %7 = arith.addf %5, %6 : vector<8x32xf32>
    %8 = math.sin %7 : vector<8x32xf32>
    %c0_4 = arith.constant 0 : index
    %c0_5 = arith.constant 0 : index
    %9 = vector.load %arg3[%c0_4, %c0_5] : memref<8x32xf32, #tpu.memory_space<vmem>>, vector<8x32xf32>
    tpu.vector_store %arg3[%c0_4, %c0_5], %8 {strides = array<i32>} : memref<8x32xf32, #tpu.memory_space<vmem>>, vector<8x32xf32>,
    return
  }
  func.func @transform_0(%arg0: i32) -> (i32, i32) {
    %c0_i32 = arith.constant 0 : i32
    %c0_i32_0 = arith.constant 0 : i32
    return %arg0, %c0_i32 : i32, i32
  }
  func.func @transform_1(%arg0: i32) -> (i32, i32) {
    %c0_i32 = arith.constant 0 : i32
    %c0_i32_0 = arith.constant 0 : i32
    %c0_i32_1 = arith.constant 0 : i32
    return %c0_i32, %c0_i32_0 : i32, i32
  }
  func.func @transform_2(%arg0: i32) -> (i32, i32) {
    %c0_i32 = arith.constant 0 : i32
    %c0_i32_0 = arith.constant 0 : i32
    return %arg0, %c0_i32 : i32, i32
  }
}

</mosaic_0001>

<bundles_post_ra>
// kernel: positional_encoder.1
= control target key start
LH: loop header
LB: loop body
LE: loop exit
PB: predicated region body
PF: predicated region fallthrough
CT: control target
= control target key end

     0   :  { %7 = vsyncpa [#allocation3], 0  ;;  %s621_s0 = inlined_call_operand.vmem [shape: f32[16,1], index: 0, kind: input, shape index: {}]   ;;  %s622_s1 = inlined_call_operand.vmem [shape: f32[2,32], index: 1, kind: input, shape index: {}]   ;;  %s623_s2 = inlined_call_operand.hbm [shape: f32[16,32], index: 2, kind: output, shape index: {}]  }
   0x1   :  { %9 = vsyncpa [#allocation3 + $0x1], 0  ;;  %s494_s9 = smov 0   ;;  %s496_s10 = smov 0  }
   0x2   :  { %s498_s11 = smov 0   ;;  %s500_s12 = smov 0  }
   0x3 LB: > { %s515_s13 = sadd.s32 4294967295, %s469_s12   ;;  %s336_s14 = sadd.s32 4294967294, %s469_s12   ;;  %s469_s12 = sphi %s500_s12, %s629_s12   ;;  %s465_s11 = sphi %s498_s11, %s628_s11   ;;  %s461_s10 = sphi %s496_s10, %s627_s10   ;;  %s457_s9 = sphi %s494_s9, %s626_s9  }
   0x4   : > { %s519_s15 = sadd.s32 1, %s469_s12   ;;  %s69_s16 = sadd.s32 1, %s465_s11 }
   0x5   : > { %s66_s17 = ssub.s32 %s469_s12, %s519_s15  ;;  %p79_p0 = scmp.ne.s32.totalorder %s465_s11, %s461_s10 }
   0x6   : > { %p67_p1 = scmp.eq.s32.totalorder %s66_s17, 0  ;;  %p80_p2 = scmp.eq.s32.totalorder %s515_s13, 1 }
   0x7   : > { %p85_p3 = scmp.ne.s32.totalorder %s461_s10, %s457_s9  ;;  %p86_p4 = scmp.eq.s32.totalorder %s336_s14, 1 }
   0x8   : > { %s530_s18 = scalar_select %p67_p1, %s465_s11, %s69_s16  }
   0x9   : > { %p532_p5 = por %p80_p2, %p79_p0  ;;  %p536_p6 = por %p86_p4, %p85_p3 }
   0xa   : > { %p339_p7 = scmp.ge.s32.totalorder %s469_s12, 1  ;;  %p114_p8 = scmp.lt.s32.totalorder %s469_s12, 3 }
   0xc   : > { %p115_p9 = pnand %p339_p7, %p114_p8 }
   0xd   : > { %p135_p10 = scmp.lt.s32.totalorder (!%p115_p9), %s515_s13, 1  ;;  %v471_v0 = vmov (!%p115_p9), 0   ;;  %v342_v2 = vld [vmem:[%s622_s1] ss:$0 sm:$0xff] (!%p115_p9)  ;;  %v343_v3 = vld [vmem:[%s622_s1 + $0x1] ss:$0 sm:$0xff] (!%p115_p9) }
   0xe   : > { %118 = sbr.rel (%p115_p9) target bundleno = 251 (0xfb), region = 28  ;;  %402 = vset.pattern.permute.xlu0 (!%p115_p9), %v471_v0  ;;  %v472_v17 = vmov (!%p115_p9), 683565275   ;;  %v473_v19 = vmov (!%p115_p9), 2475754826   ;;  %s132_s30 = sand.u32 (!%p115_p9), 1, %s461_s10  }
   0xf   : > { %v474_v22 = vmov (!%p115_p9), 2131351028   ;;  %v475_v25 = vmov (!%p115_p9), 2102212464   ;;  %v476_v28 = vmov (!%p115_p9), 920167782  }
  0x10   : > { %v477_v31 = vmov (!%p115_p9), 1326507024   ;;  %s340_s3 = sshll.u32 (!%p115_p9), %s132_s30, 3  ;;  %s349_s4 = sshll.u32 (!%p115_p9), %s515_s13, 7  ;;  %vm261_vm12 = vcmask (!%p115_p9), 261120  }
  0x11   : > { %s134_s5 = scalar_lea.vmem (!%p115_p9), [#allocation2], %s340_s3  ;;  %s579_s14 = scalar_lea.hbm (!%p115_p9), %s623_s2, %s349_s4 }
  0x12   : > { %s277_s6 = sshll.u32 (!%p115_p9), %s134_s5, 4  ;;  %s478_s17 = smov (!%p115_p9), [#allocation2]   ;;  %s581_s6 = int_to_ptr.vmem [resolvable:$true] %s277_s6 }
  0x13   : > { %s407_s16 = scalar_lea.vmem (!%p115_p9), %s581_s6, 128 }
  0x14   : > { %p408_p11 = scmp.ne.s32.totalorder (!%p115_p9), %s581_s6, %s407_s16 }
  0x15   : > { %s136_s21 = scalar_select %p135_p10, %s515_s13, 1 }
  0x16   : > { %s264_s13 = scalar_lea.sflag [#allocation3], %s132_s30  ;;  %p409_p12 = pnand %p408_p11, %p532_p5 }
  0x17   : > { %s341_s22 = sshll.u32 %s136_s21, 3  ;;  %s411_s21 = sshll.u32 %s478_s17, 4  ;;  %s412_s21 = int_to_ptr.vmem [resolvable:$false] %s411_s21 }
  0x18   : > { %s138_s25 = scalar_lea.vmem %s621_s0, %s341_s22  ;;  %p410_p13 = pneg %p409_p12 }
  0x19   : > { %v141_v1 = vld [vmem:[%s138_s25] sm:$0xff]  ;;  %s413_s22 = scalar_lea.vmem %s412_s21, 256  ;;  %p414_p0 = scmp.lt.s32.totalorder %s581_s6, %s412_s21 }
  0x1a   : > { %144 = vperm.xlu0 %402, %v141_v1   ;;  %p415_p1 = scmp.lt.s32.totalorder %s413_s22, %s407_s16 }
  0x1c   : > { %p416_p2 = por %p415_p1, %p414_p0 }
  0x1e   : > { %p417_p3 = pnand %p416_p2, %p410_p13 }
  0x99   : > { %v145_v4 = vpop.permute.xlu0 %144 }
  0x9a   : > { %v151_v5 = vmul.f32 %v342_v2, %v145_v4 }
  0x9c   : > { %v553_v6 = vadd.f32 %v343_v3, %v151_v5 }
  0x9e   : > { %v160_v7 = vand.u32 2139095040, %v553_v6  ;;  %v157_v11 = vand.u32 2147483647, %v553_v6  ;;  %vm159_vm7 = vcmp.lt.s32.totalorder %v553_v6, 0  ;;  %vm249_vm13 = vweird.f32 %v553_v6 }
  0xa0   : > { %v161_v8 = vshrl.u32 %v160_v7, 23  ;;  %v164_v14 = vand.u32 8388607, %v157_v11  ;;  %vm158_vm8 = vcmp.le.f32.partialorder %v157_v11, 0.7853982 }
  0xa2   : > { %v344_v9 = vadd.s32 4294967169, %v161_v8  ;;  %v165_v33 = vor.u32 8388608, %v164_v14 }
  0xa4   : > { %v167_v10 = vadd.s32 1, %v344_v9  ;;  %v205_v47 = vshll.u32 %v165_v33, 8 }
  0xa6   : > { %vm168_vm0 = vcmp.gt.s32.totalorder %v167_v10, 0 }
  0xa7   : > { %v169_v12 = vsel %vm168_vm0, %v167_v10, 0 }
  0xa8   : > { %v171_v13 = vand.u32 31, %v169_v12  ;;  %v170_v16 = vshrl.u32 %v169_v12, 5 }
  0xaa   : > { %v172_v15 = vsub.s32 32, %v171_v13  ;;  %v174_v18 = vshll.u32 %v472_v17, %v171_v13  ;;  %v177_v20 = vshll.u32 %v473_v19, %v171_v13  ;;  %v180_v24 = vshll.u32 %v474_v22, %v171_v13 }
  0xab   : > { %v183_v27 = vshll.u32 %v475_v25, %v171_v13  ;;  %v186_v30 = vshll.u32 %v476_v28, %v171_v13  ;;  %vm189_vm1 = vcmp.lt.s32.totalorder %v170_v16, 1  ;;  %vm192_vm2 = vcmp.lt.s32.totalorder %v170_v16, 4 }
  0xac   : > { %v175_v21 = vshrl.u32 %v473_v19, %v172_v15  ;;  %v178_v23 = vshrl.u32 %v474_v22, %v172_v15  ;;  %v181_v26 = vshrl.u32 %v475_v25, %v172_v15  ;;  %v184_v29 = vshrl.u32 %v476_v28, %v172_v15 }
  0xad   : > { %v187_v32 = vshrl.u32 %v477_v31, %v172_v15  ;;  %v173_v42 = vshrl.u32 %v472_v17, %v172_v15  ;;  %vm191_vm3 = vcmp.lt.s32.totalorder %v170_v16, 3  ;;  %vm190_vm4 = vcmp.lt.s32.totalorder %v170_v16, 2 }
  0xae   : > { %v176_v34 = vor.u32 %v175_v21, %v174_v18  ;;  %v179_v35 = vor.u32 %v178_v23, %v177_v20  ;;  %v182_v36 = vor.u32 %v181_v26, %v180_v24  ;;  %v185_v37 = vor.u32 %v184_v29, %v183_v27 }
  0xaf   : > { %v188_v38 = vor.u32 %v187_v32, %v186_v30 }
  0xb0   : > { %v194_v39 = vsel %vm192_vm2, %v182_v36, 2102212464  ;;  %v197_v40 = vsel %vm189_vm1, %v176_v34, %v179_v35  ;;  %v201_v41 = vsel %vm189_vm1, %v179_v35, %v182_v36  ;;  %v198_v43 = vsel %vm192_vm2, %v185_v37, 920167782 }
  0xb1   : > { %v202_v44 = vsel %vm192_vm2, %v188_v38, 1326507024  ;;  %v199_v45 = vsel %vm191_vm3, %v182_v36, %v198_v43  ;;  %v193_v48 = vsel %vm189_vm1, %v173_v42, %v176_v34  ;;  %v195_v49 = vsel %vm191_vm3, %v179_v35, %v194_v39 }
  0xb2   : > { %v203_v46 = vsel %vm191_vm3, %v185_v37, %v202_v44  ;;  %v200_v50 = vsel %vm190_vm4, %v197_v40, %v199_v45  ;;  %v196_v56 = vsel %vm190_vm4, %v193_v48, %v195_v49 }
  0xb3   : > { %v204_v51 = vsel %vm190_vm4, %v201_v41, %v203_v46  ;;  %v562_v54 = vmul.u32.u64.low %v205_v47, %v200_v50  ;;  %v563_v55 = vmul.u32.u64.high %v205_v47, %v200_v50, %v562_v54  ;;  %v212_v58 = vmul.u32 %v205_v47, %v196_v56 }
  0xb4   : > { %v559_v52 = vmul.u32.u64.low %v205_v47, %v204_v51  ;;  %v560_v53 = vmul.u32.u64.high %v205_v47, %v204_v51, %v559_v52 }
  0xb5   : > { %v215_v57 = vadd.s32 1, %v563_v55 }
  0xb6   : > { %vm214_vm5 = vc.u32 %v560_v53, %v562_v54  ;;  %v213_v7 = vadd.s32 %v562_v54, %v560_v53 }
  0xb7   : > { %v216_v59 = vsel %vm214_vm5, %v215_v57, %v563_v55 }
  0xb8   : > { %v217_v60 = vadd.s32 %v216_v59, %v212_v58 }
  0xba   : > { %v218_v61 = vadd.s32 536870912, %v217_v60 }
  0xbc   : > { %v219_v62 = vshrl.u32 %v218_v61, 30 }
  0xbe   : > { %v220_v63 = vshll.u32 %v219_v62, 30  ;;  %v243_v20 = vsub.s32 4, %v219_v62 }
  0xc0   : > { %v221_v0 = vsub.s32 %v217_v60, %v220_v63  ;;  %v244_v23 = vsel %vm159_vm7, %v243_v20, %v219_v62 }
  0xc1   : > { %v246_v25 = vsel %vm158_vm8, 0, %v244_v23 }
  0xc2   : > { %v223_v1 = vsub.s32 0, %v221_v0  ;;  %v250_v26 = vadd.s32 3, %v246_v25 }
  0xc4   : > { %v345_v2 = vmin.u32 %v223_v1, %v221_v0  ;;  %v251_v27 = vand.u32 3, %v250_v26 }
  0xc6   : > { %v225_v3 = vclz %v345_v2  ;;  %vm256_vm9 = vcmp.eq.s32.totalorder %v251_v27, 2  ;;  %vm253_vm10 = vcmp.eq.s32.totalorder %v251_v27, 0  ;;  %vm252_vm11 = vcmp.lt.s32.totalorder %v251_v27, 2 }
  0xc8   : > { %v346_v4 = vadd.s32 4294967294, %v225_v3 }
  0xca   : > { %vm347_vm6 = vcmp.lt.s32.totalorder %v346_v4, 0 }
  0xcb   : > { %v228_v5 = vsel %vm347_vm6, 0, %v346_v4 }
  0xcc   : > { %v229_v8 = vsub.s32 32, %v228_v5  ;;  %v233_v9 = vsub.s32 4294967266, %v228_v5  ;;  %v230_v10 = vshll.u32 %v221_v0, %v228_v5 }
  0xce   : > { %v231_v12 = vshrl.u32 %v213_v7, %v229_v8  ;;  %v234_v13 = vadd.s32 127, %v233_v9 }
  0xd0   : > { %v232_v14 = vor.u32 %v231_v12, %v230_v10  ;;  %v235_v15 = vshll.u32 %v234_v13, 23 }
  0xd2   : > { %v236_v16 = vor.u32 4788187, %v235_v15  ;;  %v239_v18 = vcvt.s32.f32 %v232_v14 }
  0xd4   : > { %v237_v17 = vand.u32 2147483647, %v236_v16 }
  0xd6   : > { %v240_v19 = vmul.f32 %v239_v18, %v237_v17 }
  0xd8   : > { %v241_v21 = vxor.u32 2147483648, %v240_v19 }
  0xda   : > { %v242_v22 = vsel %vm159_vm7, %v241_v21, %v240_v19 }
  0xdb   : > { %v245_v24 = vsel %vm158_vm8, %v553_v6, %v242_v22 }
  0xdc   : > { %403 = vcosq.f32 %v245_v24 }
  0xdd   : > { %405 = vsinq.f32 %v245_v24 }
  0xe6   : > { %v404_v28 = vpop.eup %403 }
  0xe7   : > { %v406_v29 = vpop.eup %405  ;;  %v257_v30 = vxor.u32 2147483648, %v404_v28 }
  0xe8   : > { %v254_v31 = vxor.u32 2147483648, %v406_v29 }
  0xe9   : > { %v258_v11 = vsel %vm256_vm9, %v257_v30, %v406_v29 }
  0xea   : > { %v255_v32 = vsel %vm253_vm10, %v404_v28, %v254_v31 }
  0xeb   : > { %v259_v33 = vsel %vm252_vm11, %v255_v32, %v258_v11 }
  0xec   : > { %v260_v34 = vsel %vm249_vm13, nan, %v259_v33 }
  0xed   : > { %262 = vst.msk [vmem:[%s134_s5] sm:$0xff] %vm261_vm12, %v260_v34 }
  0xee   : > { %420 = shalt.err (!%p417_p3)
}
  0xef   : > { %s421_s23 = scalar_lea.hbm %s579_s14, 128  ;;  %s425_s26 = scalar_lea.hbm %s623_s2, 256 }
  0xf0   : > { %p422_p4 = scmp.ne.s32.totalorder %s579_s14, %s421_s23  ;;  %p426_p9 = scmp.lt.u32.totalorder %s579_s14, %s623_s2 }
  0xf1   : > { %p427_p10 = scmp.lt.u32.totalorder %s425_s26, %s421_s23  ;;  %p429_p12 = scmp.lt.u32.totalorder %s421_s23, %s579_s14 }
  0xf2   : > { %p423_p7 = pnand %p422_p4, %p532_p5 }
  0xf3   : > { %p428_p11 = por %p427_p10, %p426_p9 }
  0xf4   : > { %p424_p8 = pneg %p423_p7 }
  0xf5   : > { %p430_p13 = por %p429_p12, %p428_p11 }
  0xf7   : > { %p431_p0 = pnand %p430_p13, %p424_p8 }
  0xf9   : > { %434 = shalt.err (!%p431_p0)
}
  0xfa   : > { %356 = dma.vmem_to_hbm [thread:$0]  (%p532_p5), %s581_s6, 128, %s579_s14, %s264_s13  }
  0xfb PF: > { %p362_p1 = scmp.ge.s32.totalorder %s469_s12, 2  ;;  %s289_s29 = sand.u32 1, %s457_s9  }
  0xfc   : > { %s290_s30 = scalar_lea.sflag [#allocation3], %s289_s29 }
  0xfd   : > { %p359_p2 = pnand %p362_p1, %p536_p6 }
  0xff   : > { %452 = dma.done.wait (!%p359_p2), %s290_s30, 128  }
 0x100   : > { %454 = vsyncadd (!%p359_p2), %s290_s30, 4294967168  ;;  %p12_p3 = scmp.ge.s32.totalorder %s519_s15, 4   ;;  %s626_s9 = smov %s461_s10 }
 0x101   : > { %s627_s10 = smov %s465_s11  ;;  %s628_s11 = smov %s530_s18 }
 0x102   : > { %s629_s12 = smov %s519_s15  ;;  %14 = sbr.rel (!%p12_p3) target bundleno = 3 (0x3), region = 63 }
 0x109   :  { %295 = vsyncpa [#allocation3], 1 }
 0x10a   :  { %297 = vsyncpa [#allocation3 + $0x1], 1 }

</bundles_post_ra>
